<compile_context>
chip_gen: v6e
topology: v6e:2x2x1
jax: 0.10.0
libtpu: 0.0.40
codegen_flags: <defaults>
</compile_context>

<pallas_src>
import jax
import jax.numpy as jnp
from jax import lax
from jax.experimental import pallas as pl
from jax.experimental.pallas import tpu as pltpu


# --------------------------------------------------------------------------- #
# Kernel                                                                      #
# --------------------------------------------------------------------------- #
def cheb_relu_kernel(a_ref, y2s_ref, p1_ref, e_ref, s_ref, o_ref, gs_scr):
    """One Chebyshev hop per phase.

    a_ref   : (N, N)   int8   resident 0/1 adjacency (exact)
    y2s_ref : (N, OUT) bf16   S @ Y2                      (phase-0 RHS)
    p1_ref  : (tm,OUT) f32    S @ Y1                      (row block)
    e_ref   : (tm,OUT) f32    Y0 - Y2 + b                 (row block)
    s_ref   : (tm,1)   f32    S = D^{-1/2}                (row block)
    o_ref   : (tm,OUT) f32    relu output                 (row block, phase 1)
    gs_scr  : (N, OUT) bf16   Gs = S (Y1 + 2 L_hat Y2)    (persistent scratch)
    """
    p = pl.program_id(0)                 # 0: G hop, 1: output hop + epilogue
    i = pl.program_id(1)                 # output row block
    tm = o_ref.shape[0]
    row = pl.multiple_of(i * tm, tm)

    # Row slab of the resident adjacency; int8 -> bf16 cast is exact for 0/1.
    a_blk = a_ref[pl.ds(row, tm), :].astype(jnp.bfloat16)     # (tm, N)
    s = s_ref[...]                                            # (tm, 1) f32

    @pl.when(p == 0)
    def _():
        # U0 = A (S Y2) ;  Gs = S(Y1 + 2 L_hat Y2) = S Y1 - 2 S^2 U0
        u0 = jnp.dot(a_blk, y2s_ref[...], preferred_element_type=jnp.float32)
        gs = p1_ref[...] - (2.0 * s * s) * u0
        gs_scr[pl.ds(row, tm), :] = gs.astype(gs_scr.dtype)

    @pl.when(p == 1)
    def _():
        # U1 = A Gs ;  out = relu(Y0 - Y2 + b - S U1)
        u1 = jnp.dot(a_blk, gs_scr[...], preferred_element_type=jnp.float32)
        o_ref[...] = jnp.maximum(e_ref[...] - s * u1, 0.0)


# --------------------------------------------------------------------------- #
# Wrapper                                                                     #
# --------------------------------------------------------------------------- #
def _pick_tm(n, cap=512):
    """Largest row-block <= cap that divides n (multiple of 32), else n."""
    if n <= cap:
        return n
    t = (cap // 32) * 32
    while t >= 32:
        if n % t == 0:
            return t
        t -= 32
    return n


def _vmem_budget_bytes():
    cap = 64 * 1024 * 1024
    try:
        cap = int(getattr(pltpu.get_tpu_info(), "vmem_capacity_bytes", cap) or cap)
    except Exception:
        pass
    return (3 * cap) // 4           # leave headroom for compiler-internal scratch


def _estimate_vmem_bytes(n, tm):
    lane = 128
    a_res = 2 * n * max(n, lane)                 # resident int8 A (2 buffers)
    y2s = 2 * n * lane * 2                       # resident bf16 S Y2 (lane-padded)
    rowio = 2 * 4 * tm * lane * 4                # p1, e, s, out row blocks
    gs = n * lane * 2                            # Gs scratch
    cast = 2 * tm * n * 2                        # int8->bf16 slab temporary headroom
    return a_res + y2s + rowio + gs + cast


def gcnn_block_forward(x, edge_index, W, b, *, tm=None):
    """x: [N, F] f32, edge_index: [2, E] i32, W: [3, F, OUT], b: [1, OUT]."""
    n0, f = x.shape
    k_order, _, out_f = W.shape
    assert k_order == 3, "ChebConv K=3 expected"

    # ---- plain-JAX glue (tiny): adjacency, sym-norm scales, feature transform ---
    # Pad node count to a multiple of 32 (int8 sublane tile); padded nodes are
    # isolated (degree 0, zero features) and sliced off at the end.
    n = max(32, -(-n0 // 32) * 32)
    A = jnp.zeros((n, n), jnp.float32)
    A = A.at[edge_index[0], edge_index[1]].set(1.0)   # dedups duplicate edges
    deg = A.sum(axis=1)
    s = jnp.where(deg > 0, lax.rsqrt(jnp.maximum(deg, 1.0)), 0.0)[:, None]  # (n,1)

    xp = jnp.zeros((n, f), jnp.float32).at[:n0].set(x.astype(jnp.float32))
    y0 = xp @ W[0]
    y1 = xp @ W[1]
    y2 = xp @ W[2]

    a_i8 = A.astype(jnp.int8)                           # exact, 1 byte/elem stream
    y2s = (s * y2).astype(jnp.bfloat16)                 # S Y2, pre-cast once
    p1 = (s * y1).astype(jnp.float32)                   # S Y1
    e = (y0 - y2 + b).astype(jnp.float32)               # bias folded in

    if tm is None:
        tm = _pick_tm(n)
    assert n % tm == 0, f"tm={tm} must divide padded N={n}"

    budget = _vmem_budget_bytes()
    est = _estimate_vmem_bytes(n, tm)
    if est > budget:
        # TODO(synk): stream (tm, tk) int8 adjacency tiles with an in-kernel
        # fori_loop register accumulator once N^2 exceeds VMEM residency.
        raise NotImplementedError(
            f"adjacency residency needs ~{est >> 20} MiB VMEM, budget "
            f"{budget >> 20} MiB")

    grid = (2, n // tm)   # (hop phase, output row block)

    out = pl.pallas_call(
        cheb_relu_kernel,
        out_shape=jax.ShapeDtypeStruct((n, out_f), jnp.float32),
        grid_spec=pltpu.PrefetchScalarGridSpec(
            num_scalar_prefetch=0,
            grid=grid,
            in_specs=[
                # Constant block index -> fetched from HBM exactly once, resident.
                pl.BlockSpec((n, n), lambda p, i: (0, 0)),        # A (int8)
                pl.BlockSpec((n, out_f), lambda p, i: (0, 0)),    # S Y2 (bf16)
                pl.BlockSpec((tm, out_f), lambda p, i: (i, 0)),   # S Y1
                pl.BlockSpec((tm, out_f), lambda p, i: (i, 0)),   # Y0 - Y2 + b
                pl.BlockSpec((tm, 1), lambda p, i: (i, 0)),       # D^{-1/2}
            ],
            # p*i: phase-0 visits all map to block 0 (no garbage write-backs);
            # every output block is written exactly once, in phase 1.
            out_specs=pl.BlockSpec((tm, out_f), lambda p, i: (p * i, 0)),
            scratch_shapes=[pltpu.VMEM((n, out_f), jnp.bfloat16)],   # Gs
        ),
        compiler_params=pltpu.CompilerParams(
            # Phase 1 reads Gs rows written by every phase-0 row block -> both
            # axes must execute sequentially in this fused single-stream form.
            dimension_semantics=("arbitrary", "arbitrary"),
            vmem_limit_bytes=budget,
        ),
    )(a_i8, y2s, p1, e, s)

    return out[:n0]


# --------------------------------------------------------------------------- #
# Reference + self-test                                                       #
# --------------------------------------------------------------------------- #
def reference_forward(x, edge_index, W, b):
    """Pure f32 ChebConv(K=3, sym, lambda_max=2) + ReLU."""
    n = x.shape[0]
    A = jnp.zeros((n, n), jnp.float32).at[edge_index[0], edge_index[1]].set(1.0)
    deg = A.sum(axis=1)
    s = jnp.where(deg > 0, 1.0 / jnp.sqrt(jnp.maximum(deg, 1.0)), 0.0)
    l_hat = -(s[:, None] * A * s[None, :])
    t0 = x
    t1 = l_hat @ x
    t2 = 2.0 * (l_hat @ t1) - t0
    return jnp.maximum(t0 @ W[0] + t1 @ W[1] + t2 @ W[2] + b, 0.0)


def _random_graph(key, n, e):
    k1, k2 = jax.random.split(key)
    src = jax.random.randint(k1, (e,), 0, n, dtype=jnp.int32)
    dst = (src + 1 + jax.random.randint(k2, (e,), 0, n - 1, dtype=jnp.int32)) % n
    # symmetric directed edge list, no self loops
    return jnp.concatenate([jnp.stack([src, dst]), jnp.stack([dst, src])], axis=1)


def _run_case(key, n, f, out_f, tm=None, atol=5e-2, rtol=5e-2):
    kx, ke, kw = jax.random.split(key, 3)
    x = jax.random.normal(kx, (n, f), dtype=jnp.float32)
    edge_index = _random_graph(ke, n, max(2 * n, 24))
    # init_weights: ChebConv weights ~ U(0, 0.5); ChebConv bias starts at zero.
    W = jax.random.uniform(kw, (3, f, out_f), dtype=jnp.float32,
                           minval=0.0, maxval=0.5)
    b = jnp.zeros((1, out_f), dtype=jnp.float32)

    y = jax.block_until_ready(gcnn_block_forward(x, edge_index, W, b, tm=tm))
    ref = reference_forward(x, edge_index, W, b)
    assert y.shape == (n, out_f)
    max_err = float(jnp.max(jnp.abs(y - ref)))
    # Only remaining error source: bf16 rounding of the width-8 S*Y2 / Gs
    # operands; the N x N adjacency and all scales are exact.
    assert jnp.allclose(y, ref, atol=atol, rtol=rtol), (
        f"mismatch vs f32 reference (N={n}): max abs err {max_err}")
    return y


if __name__ == "__main__":
    key = jax.random.PRNGKey(0)
    k_small, k_med = jax.random.split(key)

    # Shapes implied by the module: 16 nodes, in_features=32, ChebConv(32, 8, K=3).
    _run_case(k_small, n=16, f=32, out_f=8)

    # Medium shape exercising the (phase, row-block) grid with resident adjacency.
    _run_case(k_med, n=1024, f=32, out_f=8, tm=256)

    print("KERNEL_OK")
</pallas_src>

<mosaic_0001>
module attributes {stable_mosaic.version = 11 : i64} {
  func.func @cheb_relu_kernel(%arg0: i32, %arg1: i32, %arg2: memref<32x32xi8, #tpu.memory_space<vmem>>, %arg3: memref<32x8xbf16, #tpu.memory_space<vmem>>, %arg4: memref<32x8xf32, #tpu.memory_space<vmem>>, %arg5: memref<32x8xf32, #tpu.memory_space<vmem>>, %arg6: memref<32x1xf32, #tpu.memory_space<vmem>>, %arg7: memref<32x8xf32, #tpu.memory_space<vmem>>, %arg8: memref<32x8xbf16, #tpu.memory_space<vmem>>) attributes {dimension_semantics = [#tpu.dimension_semantics<arbitrary>, #tpu.dimension_semantics<arbitrary>], iteration_bounds = array<i64: 2, 1>, scalar_prefetch = 0 : i64, scratch_operands = 1 : i64, tpu.core_type = #tpu.core_type<tc>, window_params = [{pipeline_mode = #tpu.pipeline_mode<synchronous>, transform_indices = @transform_0, window_bounds = array<i64: 32, 32>}, {pipeline_mode = #tpu.pipeline_mode<synchronous>, transform_indices = @transform_1, window_bounds = array<i64: 32, 8>}, {transform_indices = @transform_2, window_bounds = array<i64: 32, 8>}, {transform_indices = @transform_3, window_bounds = array<i64: 32, 8>}, {transform_indices = @transform_4, window_bounds = array<i64: 32, 1>}, {transform_indices = @transform_5, window_bounds = array<i64: 32, 8>}]} {
    %c32_i32 = arith.constant 32 : i32
    %0 = arith.muli %arg1, %c32_i32 : i32
    %1 = tpu.assume_multiple %0, 32 : i32
    %2 = arith.index_cast %1 : i32 to index
    %c0 = arith.constant 0 : index
    %3 = vector.load %arg2[%2, %c0] : memref<32x32xi8, #tpu.memory_space<vmem>>, vector<32x32xi8>
    %4 = arith.sitofp %3 : vector<32x32xi8> to vector<32x32xbf16>
    %c0_0 = arith.constant 0 : index
    %c0_1 = arith.constant 0 : index
    %5 = vector.load %arg6[%c0_0, %c0_1] : memref<32x1xf32, #tpu.memory_space<vmem>>, vector<32x1xf32>
    %c0_i32 = arith.constant 0 : i32
    %6 = arith.cmpi eq, %arg0, %c0_i32 : i32
    %7 = arith.extui %6 : i1 to i32
    %c0_i32_2 = arith.constant 0 : i32
    %8 = arith.cmpi ne, %7, %c0_i32_2 : i32
    scf.if %8 {
      %c0_4 = arith.constant 0 : index
      %c0_5 = arith.constant 0 : index
      %12 = vector.load %arg3[%c0_4, %c0_5] : memref<32x8xbf16, #tpu.memory_space<vmem>>, vector<32x8xbf16>
      %cst = arith.constant dense<0.000000e+00> : vector<32x8xf32>
      %13 = tpu.matmul %4, %12, %cst {dimension_numbers = #tpu.dot_dimension_numbers<[1], [0], [0], [1], [0, 0, 1, 1], [], []>} : vector<32x32xbf16>, vector<32x8xbf16>, vector<32x8xf32> -> vector<32x8xf32>
      %c0_6 = arith.constant 0 : index
      %c0_7 = arith.constant 0 : index
      %14 = vector.load %arg4[%c0_6, %c0_7] : memref<32x8xf32, #tpu.memory_space<vmem>>, vector<32x8xf32>
      %cst_8 = arith.constant 2.000000e+00 : f32
      %15 = vector.broadcast %cst_8 : f32 to vector<32x1xf32>
      %16 = arith.mulf %15, %5 : vector<32x1xf32>
      %17 = arith.mulf %16, %5 : vector<32x1xf32>
      %18 = vector.broadcast %17 : vector<32x1xf32> to vector<32x8xf32>
      %19 = arith.mulf %18, %13 : vector<32x8xf32>
      %20 = arith.subf %14, %19 : vector<32x8xf32>
      %21 = arith.truncf %20 : vector<32x8xf32> to vector<32x8xbf16>
      %22 = arith.index_cast %1 : i32 to index
      %c0_9 = arith.constant 0 : index
      %23 = vector.load %arg8[%22, %c0_9] : memref<32x8xbf16, #tpu.memory_space<vmem>>, vector<32x8xbf16>
      tpu.vector_store %arg8[%22, %c0_9], %21 {strides = array<i32>} : memref<32x8xbf16, #tpu.memory_space<vmem>>, vector<32x8xbf16>,
    } else {
    }
    %c1_i32 = arith.constant 1 : i32
    %9 = arith.cmpi eq, %arg0, %c1_i32 : i32
    %10 = arith.extui %9 : i1 to i32
    %c0_i32_3 = arith.constant 0 : i32
    %11 = arith.cmpi ne, %10, %c0_i32_3 : i32
    scf.if %11 {
      %c0_4 = arith.constant 0 : index
      %c0_5 = arith.constant 0 : index
      %12 = vector.load %arg8[%c0_4, %c0_5] : memref<32x8xbf16, #tpu.memory_space<vmem>>, vector<32x8xbf16>
      %cst = arith.constant dense<0.000000e+00> : vector<32x8xf32>
      %13 = tpu.matmul %4, %12, %cst {dimension_numbers = #tpu.dot_dimension_numbers<[1], [0], [0], [1], [0, 0, 1, 1], [], []>} : vector<32x32xbf16>, vector<32x8xbf16>, vector<32x8xf32> -> vector<32x8xf32>
      %c0_6 = arith.constant 0 : index
      %c0_7 = arith.constant 0 : index
      %14 = vector.load %arg5[%c0_6, %c0_7] : memref<32x8xf32, #tpu.memory_space<vmem>>, vector<32x8xf32>
      %15 = vector.broadcast %5 : vector<32x1xf32> to vector<32x8xf32>
      %16 = arith.mulf %15, %13 : vector<32x8xf32>
      %17 = arith.subf %14, %16 : vector<32x8xf32>
      %cst_8 = arith.constant 0.000000e+00 : f32
      %18 = vector.broadcast %cst_8 : f32 to vector<32x8xf32>
      %19 = arith.maximumf %17, %18 : vector<32x8xf32>
      %c0_9 = arith.constant 0 : index
      %c0_10 = arith.constant 0 : index
      %20 = vector.load %arg7[%c0_9, %c0_10] : memref<32x8xf32, #tpu.memory_space<vmem>>, vector<32x8xf32>
      tpu.vector_store %arg7[%c0_9, %c0_10], %19 {strides = array<i32>} : memref<32x8xf32, #tpu.memory_space<vmem>>, vector<32x8xf32>,
    } else {
    }
    return
  }
  func.func @transform_0(%arg0: i32, %arg1: i32) -> (i32, i32) {
    %c0_i32 = arith.constant 0 : i32
    %c0_i32_0 = arith.constant 0 : i32
    %c0_i32_1 = arith.constant 0 : i32
    return %c0_i32, %c0_i32_0 : i32, i32
  }
  func.func @transform_1(%arg0: i32, %arg1: i32) -> (i32, i32) {
    %c0_i32 = arith.constant 0 : i32
    %c0_i32_0 = arith.constant 0 : i32
    %c0_i32_1 = arith.constant 0 : i32
    return %c0_i32, %c0_i32_0 : i32, i32
  }
  func.func @transform_2(%arg0: i32, %arg1: i32) -> (i32, i32) {
    %c0_i32 = arith.constant 0 : i32
    %c0_i32_0 = arith.constant 0 : i32
    return %arg1, %c0_i32 : i32, i32
  }
  func.func @transform_3(%arg0: i32, %arg1: i32) -> (i32, i32) {
    %c0_i32 = arith.constant 0 : i32
    %c0_i32_0 = arith.constant 0 : i32
    return %arg1, %c0_i32 : i32, i32
  }
  func.func @transform_4(%arg0: i32, %arg1: i32) -> (i32, i32) {
    %c0_i32 = arith.constant 0 : i32
    %c0_i32_0 = arith.constant 0 : i32
    return %arg1, %c0_i32 : i32, i32
  }
  func.func @transform_5(%arg0: i32, %arg1: i32) -> (i32, i32) {
    %0 = arith.muli %arg0, %arg1 : i32
    %c0_i32 = arith.constant 0 : i32
    %c0_i32_0 = arith.constant 0 : i32
    return %0, %c0_i32 : i32, i32
  }
}

</mosaic_0001>

<bundles_post_ra>
// kernel: tpu_custom_call.1
= control target key start
LH: loop header
LB: loop body
LE: loop exit
PB: predicated region body
PF: predicated region fallthrough
CT: control target
= control target key end

     0   :  { %s808_s18 = smov 0   ;;  %s810_s19 = smov 0   ;;  %s938_s0 = inlined_call_operand.vmem [shape: s8[32,32], index: 0, kind: input, shape index: {}]   ;;  %s939_s1 = inlined_call_operand.vmem [shape: bf16[32,8], index: 1, kind: input, shape index: {}]   ;;  %s940_s2 = inlined_call_operand.vmem [shape: f32[32,8], index: 2, kind: input, shape index: {}]   ;;  %s941_s3 = inlined_call_operand.vmem [shape: f32[32,8], index: 3, kind: input, shape index: {}]   ;;  %s942_s4 = inlined_call_operand.vmem [shape: f32[32,1], index: 4, kind: input, shape index: {}]   ;;  %s943_s5 = inlined_call_operand.vmem [shape: f32[32,8], index: 5, kind: output, shape index: {}]  }
   0x1   :  { %s812_s20 = smov 0  }
   0x2 LB: > { %s27_s21 = sadd.s32 1, %s770_s19  ;;  %p671_p0 = scmp.ge.s32.totalorder %s774_s20, 1  ;;  %s774_s20 = sphi %s812_s20, %s15_s20   ;;  %s770_s19 = sphi %s810_s19, %s945_s19   ;;  %s766_s18 = sphi %s808_s18, %s944_s18  }
   0x3   : > { %p29_p1 = scmp.ge.s32.totalorder %s27_s21, 2  ;;  %p224_p2 = scmp.lt.s32.totalorder %s774_s20, 3 }
   0x5   : > { %s947_s21 = smov (%p29_p1, %s27_s21), 0  ;;  %p225_p3 = pnand %p671_p0, %p224_p2 }
   0x6   : > { %p672_p4 = scmp.ne.s32.totalorder (!%p225_p3), %s766_s18, 0 }
   0x7   : > { %228 = sbr.rel (%p225_p3) target bundleno = 454 (0x1c6), region = 40 }
   0xc   : > { %v831_v0 = vld [vmem:[%s938_s0] sm:$0xff]  ;;  %v841_v2 = vld [vmem:[%s942_s4 + $0x8] sm:$0xff]  ;;  %v848_v5 = vld [vmem:[%s942_s4 + $0x10] sm:$0xff]  ;;  %305 = sbr.rel (%p672_p4) target bundleno = 232 (0xe8), region = 44 }
   0xd   : > { %v836_v1 = vld [vmem:[%s942_s4] sm:$0xff]  ;;  %v296_v3 = vunpack.c.l.s8.bf16 %v831_v0  ;;  %v297_v4 = vunpack.c.h.s8.bf16 %v831_v0  ;;  %v853_v6 = vld [vmem:[%s942_s4 + $0x18] sm:$0xff] }
  0x11   : > { %v746_v7 = vld [vmem:[%s939_s1 + $0x8] sm:$0xff]   ;;  %vm322_vm0 = vcmask 261120   ;;  %v747_v8 = vld [vmem:[%s939_s1] sm:$0xff]   ;;  %v776_v9 = vmov 0   ;;  %v384_v10 = vmul.f32 2.0, %v848_v5  ;;  %v382_v11 = vmul.f32 2.0, %v836_v1 }
  0x12   : > { %706 = vmatprep.mubr.msk.bf16.mxu0 %vm322_vm0, %v296_v3  ;;  %702 = vmatprep.subr.bf16.mxu0 %v746_v7  ;;  %v385_v12 = vmul.f32 2.0, %v853_v6  ;;  %v383_v13 = vmul.f32 2.0, %v841_v2  ;;  %v380_v21 = vld [vmem:[%s940_s2 + $0x10] sm:$0xff]  ;;  %v378_v24 = vld [vmem:[%s940_s2] sm:$0xff]  ;;  %vm438_vm1 = vcmask 60416   ;;  %v381_v29 = vld [vmem:[%s940_s2 + $0x18] sm:$0xff] }
  0x13   : > { %745 = vset.pattern.permute.xlu1 %v776_v9  ;;  %703 = vmatpush3.bf16.msra.mxu0 %v746_v7  ;;  %v388_v14 = vmul.f32 %v384_v10, %v848_v5  ;;  %v386_v15 = vmul.f32 %v382_v11, %v836_v1  ;;  %v379_v35 = vld [vmem:[%s940_s2 + $0x8] sm:$0xff] }
  0x14   : > { %744 = vset.pattern.permute.xlu0 %v776_v9  ;;  %704 = vmatprep.subr.bf16.mxu0 %v747_v8  ;;  %v389_v16 = vmul.f32 %v385_v12, %v853_v6  ;;  %v387_v17 = vmul.f32 %v383_v13, %v841_v2 }
  0x15   : > { %402 = vperm.xlu1 %745, %v388_v14   ;;  %392 = vperm.xlu0 %744, %v386_v15  }
  0x17   : > { %705 = vmatpush3.bf16.msra.mxu0 %v747_v8 }
  0x19   : > { %407 = vperm.xlu1 %745, %v389_v16   ;;  %397 = vperm.xlu0 %744, %v387_v17  }
  0x1a   : > { %707 = vmatmul.mubr.msk.bf16.vlgmr.msra.gmra.mxu0 %vm322_vm0, %v297_v4 }
  0x90   : > { %v403_v18 = vpop.permute.xlu1 %402  ;;  %v393_v19 = vpop.permute.xlu0 %392 }
  0x94   : > { %v408_v27 = vpop.permute.xlu1 %407  ;;  %v398_v33 = vpop.permute.xlu0 %397 }
  0xda   : > { %v708_v20 = vpop.f32.mrf.mxu0 }
  0xdb   : > { %v412_v22 = vmul.f32 %v708_v20, %v403_v18 }
  0xdc   : > { %v363_v23 = vpop.f32.mrf.mxu0 }
  0xdd   : > { %v416_v25 = vsub.f32 %v380_v21, %v412_v22  ;;  %v410_v26 = vmul.f32 %v393_v19, %v363_v23 }
  0xde   : > { %v709_v28 = vpop.f32.mrf.mxu0 }
  0xdf   : > { %v692_v30 = vpack.c.bf16 %v416_v25, %v416_v25  ;;  %v414_v31 = vsub.f32 %v378_v24, %v410_v26  ;;  %v413_v32 = vmul.f32 %v709_v28, %v408_v27 }
  0xe0   : > { %v366_v34 = vpop.f32.mrf.mxu0 }
  0xe1   : > { %441 = vst.msk [vmem:[#allocation2 + $0x8] sm:$0xf] %vm438_vm1, %v692_v30  ;;  %v690_v36 = vpack.c.bf16 %v414_v31, %v414_v31  ;;  %v417_v37 = vsub.f32 %v381_v29, %v413_v32  ;;  %v411_v38 = vmul.f32 %v398_v33, %v366_v34 }
  0xe3   : > { %439 = vst.msk [vmem:[#allocation2] sm:$0xf] %vm438_vm1, %v690_v36  ;;  %v693_v39 = vpack.c.bf16 %v417_v37, %v417_v37  ;;  %v415_v40 = vsub.f32 %v379_v35, %v411_v38 }
  0xe5   : > { %442 = vst.msk [vmem:[#allocation2 + $0xc] sm:$0xf] %vm438_vm1, %v693_v39  ;;  %v691_v41 = vpack.c.bf16 %v415_v40, %v415_v40 }
  0xe7   : > { %440 = vst.msk [vmem:[#allocation2 + $0x4] sm:$0xf] %vm438_vm1, %v691_v41 }
  0xe8 PF: > { %p681_p5 = scmp.ne.s32.totalorder %s766_s18, 1 }
  0xea   : > { %446 = sbr.rel (%p681_p5) target bundleno = 454 (0x1c6), region = 48 }
  0xef   : > { %v750_v42 = vld [vmem:[#allocation2 + $0x8] sm:$0xff]   ;;  %vm463_vm2 = vcmask 261120   ;;  %v751_v43 = vld [vmem:[#allocation2] sm:$0xff]   ;;  %v777_v44 = vmov 0   ;;  %v521_v48 = vld [vmem:[%s941_s3 + $0x10] sm:$0xff]  ;;  %vm555_vm3 = vcmask 64512  }
  0xf0   : > { %714 = vmatprep.mubr.msk.bf16.mxu0 %vm463_vm2, %v296_v3  ;;  %710 = vmatprep.subr.bf16.mxu0 %v750_v42  ;;  %v519_v51 = vld [vmem:[%s941_s3] sm:$0xff]  ;;  %v522_v56 = vld [vmem:[%s941_s3 + $0x18] sm:$0xff]  ;;  %v520_v62 = vld [vmem:[%s941_s3 + $0x8] sm:$0xff] }
  0xf1   : > { %749 = vset.pattern.permute.xlu1 %v777_v44  ;;  %711 = vmatpush3.bf16.msra.mxu0 %v750_v42 }
  0xf2   : > { %748 = vset.pattern.permute.xlu0 %v777_v44  ;;  %712 = vmatprep.subr.bf16.mxu0 %v751_v43 }
  0xf3   : > { %535 = vperm.xlu1 %749, %v848_v5   ;;  %525 = vperm.xlu0 %748, %v836_v1  }
  0xf5   : > { %713 = vmatpush3.bf16.msra.mxu0 %v751_v43 }
  0xf7   : > { %540 = vperm.xlu1 %749, %v853_v6   ;;  %530 = vperm.xlu0 %748, %v841_v2  }
  0xf8   : > { %715 = vmatmul.mubr.msk.bf16.vlgmr.msra.gmra.mxu0 %vm463_vm2, %v297_v4 }
 0x16e   : > { %v536_v45 = vpop.permute.xlu1 %535  ;;  %v526_v46 = vpop.permute.xlu0 %525 }
 0x172   : > { %v541_v54 = vpop.permute.xlu1 %540  ;;  %v531_v60 = vpop.permute.xlu0 %530 }
 0x1b8   : > { %v716_v47 = vpop.f32.mrf.mxu0 }
 0x1b9   : > { %v545_v49 = vmul.f32 %v716_v47, %v536_v45 }
 0x1ba   : > { %v504_v50 = vpop.f32.mrf.mxu0 }
 0x1bb   : > { %v549_v52 = vsub.f32 %v521_v48, %v545_v49  ;;  %v543_v53 = vmul.f32 %v526_v46, %v504_v50 }
 0x1bc   : > { %v717_v55 = vpop.f32.mrf.mxu0 }
 0x1bd   : > { %v553_v57 = vmax.f32 %v549_v52, 0.0  ;;  %v547_v58 = vsub.f32 %v519_v51, %v543_v53  ;;  %v546_v59 = vmul.f32 %v717_v55, %v541_v54 }
 0x1be   : > { %v507_v61 = vpop.f32.mrf.mxu0 }
 0x1bf   : > { %558 = vst.msk [vmem:[%s943_s5 + $0x10] sm:$0xff] %vm555_vm3, %v553_v57  ;;  %v551_v63 = vmax.f32 %v547_v58, 0.0  ;;  %v550_v0 = vsub.f32 %v522_v56, %v546_v59  ;;  %v544_v1 = vmul.f32 %v531_v60, %v507_v61 }
 0x1c1   : > { %556 = vst.msk [vmem:[%s943_s5] sm:$0xff] %vm555_vm3, %v551_v63  ;;  %v554_v2 = vmax.f32 %v550_v0, 0.0  ;;  %v548_v3 = vsub.f32 %v520_v62, %v544_v1 }
 0x1c3   : > { %559 = vst.msk [vmem:[%s943_s5 + $0x18] sm:$0xff] %vm555_vm3, %v554_v2  ;;  %v552_v4 = vmax.f32 %v548_v3, 0.0 }
 0x1c5   : > { %557 = vst.msk [vmem:[%s943_s5 + $0x8] sm:$0xff] %vm555_vm3, %v552_v4 }
 0x1c6 PF: > { %s15_s20 = sadd.s32 1, %s774_s20   ;;  %s944_s18 = smov %s770_s19 }
 0x1c7   : > { %p12_p6 = scmp.ge.s32.totalorder %s15_s20, 4   ;;  %s945_s19 = smov %s947_s21 }
 0x1c9   :  { %14 = sbr.rel (!%p12_p6) target bundleno = 2 (0x2), region = 86 }

</bundles_post_ra>
